<compile_context>
chip_gen: v5e
topology: v5e:2x2
jax: 0.10.0
libtpu: 0.0.40
codegen_flags: <defaults>
</compile_context>

<pallas_src>
from functools import partial

import numpy as np
import jax
import jax.numpy as jnp
from jax.experimental import pallas as pl
from jax.experimental.pallas import tpu as pltpu

HEADS = 4          # heads argument of TransformerBlock
EPS = 1e-5         # BatchNorm1d default eps


def _cparams():
    return pltpu.CompilerParams(
        dimension_semantics=("parallel",),
        vmem_limit_bytes=32 * 1024 * 1024,
    )


# ---------------------------------------------------------------------------
# Kernel A: fused QKV projection + multi-head attention + unify heads
#           + residual + BatchNorm#1 partial statistics
# ---------------------------------------------------------------------------
def attn_block_kernel(x_ref, wqkv_ref, wu_ref, bu_ref,
                      att_ref, s1_ref, sq1_ref, *, heads=HEADS):
    f32, bf16 = jnp.float32, jnp.bfloat16
    _, T, K = x_ref.shape
    H = heads
    HK = H * K

    x = x_ref[0]                                                   # (T, K) f32
    # Fused Q/K/V projection: one (T,K)@(K,3HK) bf16 MXU matmul.  The 1/sqrt(K)
    # attention scale was folded into the Q columns by the wrapper.
    qkv = jnp.dot(x.astype(bf16), wqkv_ref[...],
                  preferred_element_type=f32)                      # (T, 3HK)
    qkv_b = qkv.astype(bf16)

    # Per-head attention on static 32-lane slices of the fused projection.
    # H is a static Python constant -> the loop is unrolled at trace time.
    head_outs = []
    for h in range(H):
        q_h = qkv_b[:, h * K:(h + 1) * K]                          # (T, K)
        k_h = qkv_b[:, HK + h * K:HK + (h + 1) * K]                # (T, K)
        v_h = qkv_b[:, 2 * HK + h * K:2 * HK + (h + 1) * K]        # (T, K)
        logits = jnp.einsum("td,sd->ts", q_h, k_h,
                            preferred_element_type=f32)            # (T, T) f32
        m = jnp.max(logits, axis=-1, keepdims=True)
        e = jnp.exp(logits - m)
        p = (e / jnp.sum(e, axis=-1, keepdims=True)).astype(bf16)  # exact softmax
        head_outs.append(
            jnp.dot(p, v_h, preferred_element_type=f32).astype(bf16))

    # Unify heads with ONE 128-deep contraction (T,HK)@(HK,K), then residual.
    out_flat = jnp.concatenate(head_outs, axis=-1)                 # (T, HK) bf16
    acc = x + bu_ref[...] + jnp.dot(out_flat, wu_ref[...],
                                    preferred_element_type=f32)    # (T, K) f32

    att_ref[0] = acc.astype(att_ref.dtype)                         # bf16 to HBM
    s1_ref[0] = jnp.sum(acc, axis=0, keepdims=True)                # BN1 partials
    sq1_ref[0] = jnp.sum(acc * acc, axis=0, keepdims=True)


# ---------------------------------------------------------------------------
# Kernel B: BN1 apply (folded scale/shift) + MLP + residual
#           + BatchNorm#2 partial statistics, over flattened (B*T, K) rows
# ---------------------------------------------------------------------------
def mlp_block_kernel(att_ref, sc1_ref, sh1_ref, w1_ref, b1_ref, w2_ref, b2_ref,
                     ff_ref, s2_ref, sq2_ref):
    f32, bf16 = jnp.float32, jnp.bfloat16
    att = att_ref[...].astype(f32)                                 # (RT, K)
    xn = att * sc1_ref[...] + sh1_ref[...]                         # BatchNorm #1
    hid = jnp.dot(xn.astype(bf16), w1_ref[...],
                  preferred_element_type=f32) + b1_ref[...]        # (RT, 4K)
    hid = jnp.maximum(hid, 0.0)
    ff = jnp.dot(hid.astype(bf16), w2_ref[...],
                 preferred_element_type=f32) + b2_ref[...]         # (RT, K)
    ff = ff + xn                                                   # residual 2
    ff_ref[...] = ff.astype(ff_ref.dtype)                          # bf16 to HBM
    s2_ref[0] = jnp.sum(ff, axis=0, keepdims=True)                 # BN2 partials
    sq2_ref[0] = jnp.sum(ff * ff, axis=0, keepdims=True)


# ---------------------------------------------------------------------------
# Wrapper
# ---------------------------------------------------------------------------
def _row_tile(n_rows):
    # Fold batch*time rows into MXU-sized M tiles; fall back to the whole slab.
    for cand in (256, 128, 64, 32, 16, 8):
        if n_rows >= cand and n_rows % cand == 0:
            return cand
    return n_rows


def transformer_block(x, params, heads=HEADS):
    B, T, K = x.shape
    H = heads
    HK = H * K
    f32, bf16 = jnp.float32, jnp.bfloat16
    n = B * T

    # Fold the 1/sqrt(K) attention scale into the Q weights and fuse Q/K/V into
    # one (K, 3HK) bf16 weight so the projection is a single MXU matmul.
    wqkv = jnp.concatenate(
        [params["wq"] * (float(K) ** -0.5), params["wk"], params["wv"]],
        axis=1).astype(bf16)                                       # (K, 3HK)
    wu = params["wu"].astype(bf16)                                 # (HK, K)
    w1 = params["w1"].astype(bf16)                                 # (K, 4K)
    w2 = params["w2"].astype(bf16)                                 # (4K, K)

    def full(a):  # resident block: whole array, constant index_map
        nd = a.ndim
        return pl.BlockSpec(a.shape, lambda i, _nd=nd: (0,) * _nd)

    cp = _cparams()

    # -------- Kernel A: fused QKV + attention + unify + residual ------------
    btk = pl.BlockSpec((1, T, K), lambda b: (b, 0, 0))
    b1k = pl.BlockSpec((1, 1, K), lambda b: (b, 0, 0))
    att, s1, sq1 = pl.pallas_call(
        partial(attn_block_kernel, heads=H),
        grid=(B,),
        in_specs=[btk, full(wqkv), full(wu), full(params["bu"])],
        out_specs=[btk, b1k, b1k],
        out_shape=[jax.ShapeDtypeStruct((B, T, K), bf16),
                   jax.ShapeDtypeStruct((B, 1, K), f32),
                   jax.ShapeDtypeStruct((B, 1, K), f32)],
        compiler_params=cp,
    )(x, wqkv, wu, params["bu"])

    # BatchNorm #1 batch statistics (training mode, biased variance) folded
    # into a single scale/shift.
    # TODO(synk): use a Welford-style combine if feature magnitudes can be
    #   large; E[x^2]-E[x]^2 cancels catastrophically when |mean| >> std.
    mean1 = jnp.sum(s1, axis=0) / n                                # (1, K)
    var1 = jnp.maximum(jnp.sum(sq1, axis=0) / n - mean1 * mean1, 0.0)
    sc1 = params["g1"] * jax.lax.rsqrt(var1 + EPS)
    sh1 = params["be1"] - mean1 * sc1

    # -------- Kernel B: BN1 apply + MLP + residual ---------------------------
    att2 = att.reshape(n, K)                                       # free view
    RT = _row_tile(n)
    NT = n // RT
    row_spec = pl.BlockSpec((RT, K), lambda i: (i, 0))
    stat_spec = pl.BlockSpec((1, 1, K), lambda i: (i, 0, 0))
    ff, s2, sq2 = pl.pallas_call(
        mlp_block_kernel,
        grid=(NT,),
        in_specs=[row_spec, full(sc1), full(sh1), full(w1), full(params["b1"]),
                  full(w2), full(params["b2"])],
        out_specs=[row_spec, stat_spec, stat_spec],
        out_shape=[jax.ShapeDtypeStruct((n, K), bf16),
                   jax.ShapeDtypeStruct((NT, 1, K), f32),
                   jax.ShapeDtypeStruct((NT, 1, K), f32)],
        compiler_params=cp,
    )(att2, sc1, sh1, w1, params["b1"], w2, params["b2"])

    # BatchNorm #2: combine partial stats + elementwise apply.  Per the perf
    # review the standalone elementwise Pallas pass was dropped; XLA fuses this
    # scale/shift without an extra custom-call / pipeline-setup boundary.
    mean2 = jnp.sum(s2, axis=(0, 1)) / n                           # (K,)
    var2 = jnp.maximum(jnp.sum(sq2, axis=(0, 1)) / n - mean2 * mean2, 0.0)
    sc2 = params["g2"][0] * jax.lax.rsqrt(var2 + EPS)
    sh2 = params["be2"][0] - mean2 * sc2
    out = ff.astype(f32) * sc2 + sh2
    return out.reshape(B, T, K)


# ----------------- plain-JAX (f32) reference for verification -----------------
def reference_block(x, p):
    B, T, K = x.shape
    H = HEADS
    x2 = x.reshape(B * T, K)
    q = (x2 @ p["wq"]).reshape(B, T, H, K).transpose(0, 2, 1, 3)   # (B,H,T,K)
    k = (x2 @ p["wk"]).reshape(B, T, H, K).transpose(0, 2, 1, 3)
    v = (x2 @ p["wv"]).reshape(B, T, H, K).transpose(0, 2, 1, 3)
    scale = K ** (-0.25)
    dot = jnp.einsum("bhtd,bhsd->bhts", q * scale, k * scale)
    dot = jax.nn.softmax(dot, axis=-1)
    out = jnp.einsum("bhts,bhsd->bhtd", dot, v)
    out = out.transpose(0, 2, 1, 3).reshape(B * T, H * K)
    att = out @ p["wu"] + p["bu"] + x2

    def bn(z, g, b):
        m = jnp.mean(z, axis=0, keepdims=True)
        vv = jnp.mean((z - m) ** 2, axis=0, keepdims=True)
        return (z - m) / jnp.sqrt(vv + EPS) * g + b

    xn = bn(att, p["g1"], p["be1"])
    ff = jnp.maximum(xn @ p["w1"] + p["b1"], 0.0) @ p["w2"] + p["b2"] + xn
    return bn(ff, p["g2"], p["be2"]).reshape(B, T, K)


def init_params(key, K, H):
    ks = jax.random.split(key, 10)

    def lin(k_, fan_in, shape):
        bound = 1.0 / np.sqrt(fan_in)
        return jax.random.uniform(k_, shape, jnp.float32, -bound, bound)

    return {
        "wq": lin(ks[0], K, (K, K * H)),
        "wk": lin(ks[1], K, (K, K * H)),
        "wv": lin(ks[2], K, (K, K * H)),
        "wu": lin(ks[3], K * H, (K * H, K)),
        "bu": lin(ks[4], K * H, (1, K)),
        "w1": lin(ks[5], K, (K, 4 * K)),
        "b1": lin(ks[6], K, (1, 4 * K)),
        "w2": lin(ks[7], 4 * K, (4 * K, K)),
        "b2": lin(ks[8], 4 * K, (1, K)),
        "g1": jnp.ones((1, K), jnp.float32),
        "be1": jnp.zeros((1, K), jnp.float32),
        "g2": jnp.ones((1, K), jnp.float32),
        "be2": jnp.zeros((1, K), jnp.float32),
    }


if __name__ == "__main__":
    B, T, K = 2, 8, 32                       # small shapes; heads = HEADS = 4
    key = jax.random.PRNGKey(0)
    kx, kp = jax.random.split(key)
    x = jax.random.normal(kx, (B, T, K), jnp.float32)
    params = init_params(kp, K, HEADS)

    fwd = jax.jit(transformer_block)
    out = fwd(x, params)
    out = jax.block_until_ready(out)

    ref = reference_block(x, params)
    np.testing.assert_allclose(np.asarray(out), np.asarray(ref),
                               rtol=2e-2, atol=2e-2)
    print("KERNEL_OK")
</pallas_src>

<mosaic_0001>
module attributes {stable_mosaic.version = 11 : i64} {
  func.func @attn_block_kernel(%arg0: i32, %arg1: memref<1x8x32xf32, #tpu.memory_space<vmem>>, %arg2: memref<32x384xbf16, #tpu.memory_space<vmem>>, %arg3: memref<128x32xbf16, #tpu.memory_space<vmem>>, %arg4: memref<1x32xf32, #tpu.memory_space<vmem>>, %arg5: memref<1x8x32xbf16, #tpu.memory_space<vmem>>, %arg6: memref<1x1x32xf32, #tpu.memory_space<vmem>>, %arg7: memref<1x1x32xf32, #tpu.memory_space<vmem>>) attributes {dimension_semantics = [#tpu.dimension_semantics<parallel>], iteration_bounds = array<i64: 2>, scalar_prefetch = 0 : i64, scratch_operands = 0 : i64, tpu.core_type = #tpu.core_type<tc>, window_params = [{transform_indices = @transform_0, window_bounds = array<i64: 1, 8, 32>}, {pipeline_mode = #tpu.pipeline_mode<synchronous>, transform_indices = @transform_1, window_bounds = array<i64: 32, 384>}, {pipeline_mode = #tpu.pipeline_mode<synchronous>, transform_indices = @transform_2, window_bounds = array<i64: 128, 32>}, {pipeline_mode = #tpu.pipeline_mode<synchronous>, transform_indices = @transform_3, window_bounds = array<i64: 1, 32>}, {transform_indices = @transform_4, window_bounds = array<i64: 1, 8, 32>}, {transform_indices = @transform_5, window_bounds = array<i64: 1, 1, 32>}, {transform_indices = @transform_6, window_bounds = array<i64: 1, 1, 32>}]} {
    %c0 = arith.constant 0 : index
    %c0_0 = arith.constant 0 : index
    %c0_1 = arith.constant 0 : index
    %0 = vector.load %arg1[%c0, %c0_0, %c0_1] : memref<1x8x32xf32, #tpu.memory_space<vmem>>, vector<1x8x32xf32>
    %1 = vector.shape_cast %0 : vector<1x8x32xf32> to vector<8x32xf32>
    %2 = arith.truncf %1 : vector<8x32xf32> to vector<8x32xbf16>
    %c0_2 = arith.constant 0 : index
    %c0_3 = arith.constant 0 : index
    %3 = vector.load %arg2[%c0_2, %c0_3] : memref<32x384xbf16, #tpu.memory_space<vmem>>, vector<32x384xbf16>
    %cst = arith.constant dense<0.000000e+00> : vector<8x384xf32>
    %4 = tpu.matmul %2, %3, %cst {dimension_numbers = #tpu.dot_dimension_numbers<[1], [0], [0], [1], [0, 0, 1, 1], [], []>} : vector<8x32xbf16>, vector<32x384xbf16>, vector<8x384xf32> -> vector<8x384xf32>
    %5 = arith.truncf %4 : vector<8x384xf32> to vector<8x384xbf16>
    %6 = vector.extract_strided_slice %5 {offsets = [0, 0], sizes = [8, 32], strides = [1, 1]} : vector<8x384xbf16> to vector<8x32xbf16>
    %7 = vector.extract_strided_slice %5 {offsets = [0, 128], sizes = [8, 32], strides = [1, 1]} : vector<8x384xbf16> to vector<8x32xbf16>
    %8 = vector.extract_strided_slice %5 {offsets = [0, 256], sizes = [8, 32], strides = [1, 1]} : vector<8x384xbf16> to vector<8x32xbf16>
    "tpu.trace_start"() <{level = 10 : i32, message = "td,sd->ts"}> : () -> ()
    %cst_4 = arith.constant dense<0.000000e+00> : vector<8x8xf32>
    %9 = tpu.matmul %6, %7, %cst_4 {dimension_numbers = #tpu.dot_dimension_numbers<[1], [1], [0], [0], [0, 0, 1, 0], [], []>} : vector<8x32xbf16>, vector<8x32xbf16>, vector<8x8xf32> -> vector<8x8xf32>
    "tpu.trace_stop"() : () -> ()
    %cst_5 = arith.constant dense<0xFF800000> : vector<8xf32>
    %10 = vector.multi_reduction <maximumf>, %9, %cst_5 [1] : vector<8x8xf32> to vector<8xf32>
    %11 = vector.shape_cast %10 : vector<8xf32> to vector<8x1xf32>
    %12 = vector.broadcast %11 : vector<8x1xf32> to vector<8x8xf32>
    %13 = arith.subf %9, %12 : vector<8x8xf32>
    %14 = math.exp %13 : vector<8x8xf32>
    %cst_6 = arith.constant dense<0.000000e+00> : vector<8xf32>
    %15 = vector.multi_reduction <add>, %14, %cst_6 [1] : vector<8x8xf32> to vector<8xf32>
    %16 = vector.shape_cast %15 : vector<8xf32> to vector<8x1xf32>
    %17 = vector.broadcast %16 : vector<8x1xf32> to vector<8x8xf32>
    %18 = arith.divf %14, %17 : vector<8x8xf32>
    %19 = arith.truncf %18 : vector<8x8xf32> to vector<8x8xbf16>
    %cst_7 = arith.constant dense<0.000000e+00> : vector<8x32xf32>
    %20 = tpu.matmul %19, %8, %cst_7 {dimension_numbers = #tpu.dot_dimension_numbers<[1], [0], [0], [1], [0, 0, 1, 1], [], []>} : vector<8x8xbf16>, vector<8x32xbf16>, vector<8x32xf32> -> vector<8x32xf32>
    %21 = arith.truncf %20 : vector<8x32xf32> to vector<8x32xbf16>
    %22 = vector.extract_strided_slice %5 {offsets = [0, 32], sizes = [8, 32], strides = [1, 1]} : vector<8x384xbf16> to vector<8x32xbf16>
    %23 = vector.extract_strided_slice %5 {offsets = [0, 160], sizes = [8, 32], strides = [1, 1]} : vector<8x384xbf16> to vector<8x32xbf16>
    %24 = vector.extract_strided_slice %5 {offsets = [0, 288], sizes = [8, 32], strides = [1, 1]} : vector<8x384xbf16> to vector<8x32xbf16>
    "tpu.trace_start"() <{level = 10 : i32, message = "td,sd->ts"}> : () -> ()
    %cst_8 = arith.constant dense<0.000000e+00> : vector<8x8xf32>
    %25 = tpu.matmul %22, %23, %cst_8 {dimension_numbers = #tpu.dot_dimension_numbers<[1], [1], [0], [0], [0, 0, 1, 0], [], []>} : vector<8x32xbf16>, vector<8x32xbf16>, vector<8x8xf32> -> vector<8x8xf32>
    "tpu.trace_stop"() : () -> ()
    %cst_9 = arith.constant dense<0xFF800000> : vector<8xf32>
    %26 = vector.multi_reduction <maximumf>, %25, %cst_9 [1] : vector<8x8xf32> to vector<8xf32>
    %27 = vector.shape_cast %26 : vector<8xf32> to vector<8x1xf32>
    %28 = vector.broadcast %27 : vector<8x1xf32> to vector<8x8xf32>
    %29 = arith.subf %25, %28 : vector<8x8xf32>
    %30 = math.exp %29 : vector<8x8xf32>
    %cst_10 = arith.constant dense<0.000000e+00> : vector<8xf32>
    %31 = vector.multi_reduction <add>, %30, %cst_10 [1] : vector<8x8xf32> to vector<8xf32>
    %32 = vector.shape_cast %31 : vector<8xf32> to vector<8x1xf32>
    %33 = vector.broadcast %32 : vector<8x1xf32> to vector<8x8xf32>
    %34 = arith.divf %30, %33 : vector<8x8xf32>
    %35 = arith.truncf %34 : vector<8x8xf32> to vector<8x8xbf16>
    %cst_11 = arith.constant dense<0.000000e+00> : vector<8x32xf32>
    %36 = tpu.matmul %35, %24, %cst_11 {dimension_numbers = #tpu.dot_dimension_numbers<[1], [0], [0], [1], [0, 0, 1, 1], [], []>} : vector<8x8xbf16>, vector<8x32xbf16>, vector<8x32xf32> -> vector<8x32xf32>
    %37 = arith.truncf %36 : vector<8x32xf32> to vector<8x32xbf16>
    %38 = vector.extract_strided_slice %5 {offsets = [0, 64], sizes = [8, 32], strides = [1, 1]} : vector<8x384xbf16> to vector<8x32xbf16>
    %39 = vector.extract_strided_slice %5 {offsets = [0, 192], sizes = [8, 32], strides = [1, 1]} : vector<8x384xbf16> to vector<8x32xbf16>
    %40 = vector.extract_strided_slice %5 {offsets = [0, 320], sizes = [8, 32], strides = [1, 1]} : vector<8x384xbf16> to vector<8x32xbf16>
    "tpu.trace_start"() <{level = 10 : i32, message = "td,sd->ts"}> : () -> ()
    %cst_12 = arith.constant dense<0.000000e+00> : vector<8x8xf32>
    %41 = tpu.matmul %38, %39, %cst_12 {dimension_numbers = #tpu.dot_dimension_numbers<[1], [1], [0], [0], [0, 0, 1, 0], [], []>} : vector<8x32xbf16>, vector<8x32xbf16>, vector<8x8xf32> -> vector<8x8xf32>
    "tpu.trace_stop"() : () -> ()
    %cst_13 = arith.constant dense<0xFF800000> : vector<8xf32>
    %42 = vector.multi_reduction <maximumf>, %41, %cst_13 [1] : vector<8x8xf32> to vector<8xf32>
    %43 = vector.shape_cast %42 : vector<8xf32> to vector<8x1xf32>
    %44 = vector.broadcast %43 : vector<8x1xf32> to vector<8x8xf32>
    %45 = arith.subf %41, %44 : vector<8x8xf32>
    %46 = math.exp %45 : vector<8x8xf32>
    %cst_14 = arith.constant dense<0.000000e+00> : vector<8xf32>
    %47 = vector.multi_reduction <add>, %46, %cst_14 [1] : vector<8x8xf32> to vector<8xf32>
    %48 = vector.shape_cast %47 : vector<8xf32> to vector<8x1xf32>
    %49 = vector.broadcast %48 : vector<8x1xf32> to vector<8x8xf32>
    %50 = arith.divf %46, %49 : vector<8x8xf32>
    %51 = arith.truncf %50 : vector<8x8xf32> to vector<8x8xbf16>
    %cst_15 = arith.constant dense<0.000000e+00> : vector<8x32xf32>
    %52 = tpu.matmul %51, %40, %cst_15 {dimension_numbers = #tpu.dot_dimension_numbers<[1], [0], [0], [1], [0, 0, 1, 1], [], []>} : vector<8x8xbf16>, vector<8x32xbf16>, vector<8x32xf32> -> vector<8x32xf32>
    %53 = arith.truncf %52 : vector<8x32xf32> to vector<8x32xbf16>
    %54 = vector.extract_strided_slice %5 {offsets = [0, 96], sizes = [8, 32], strides = [1, 1]} : vector<8x384xbf16> to vector<8x32xbf16>
    %55 = vector.extract_strided_slice %5 {offsets = [0, 224], sizes = [8, 32], strides = [1, 1]} : vector<8x384xbf16> to vector<8x32xbf16>
    %56 = vector.extract_strided_slice %5 {offsets = [0, 352], sizes = [8, 32], strides = [1, 1]} : vector<8x384xbf16> to vector<8x32xbf16>
    "tpu.trace_start"() <{level = 10 : i32, message = "td,sd->ts"}> : () -> ()
    %cst_16 = arith.constant dense<0.000000e+00> : vector<8x8xf32>
    %57 = tpu.matmul %54, %55, %cst_16 {dimension_numbers = #tpu.dot_dimension_numbers<[1], [1], [0], [0], [0, 0, 1, 0], [], []>} : vector<8x32xbf16>, vector<8x32xbf16>, vector<8x8xf32> -> vector<8x8xf32>
    "tpu.trace_stop"() : () -> ()
    %cst_17 = arith.constant dense<0xFF800000> : vector<8xf32>
    %58 = vector.multi_reduction <maximumf>, %57, %cst_17 [1] : vector<8x8xf32> to vector<8xf32>
    %59 = vector.shape_cast %58 : vector<8xf32> to vector<8x1xf32>
    %60 = vector.broadcast %59 : vector<8x1xf32> to vector<8x8xf32>
    %61 = arith.subf %57, %60 : vector<8x8xf32>
    %62 = math.exp %61 : vector<8x8xf32>
    %cst_18 = arith.constant dense<0.000000e+00> : vector<8xf32>
    %63 = vector.multi_reduction <add>, %62, %cst_18 [1] : vector<8x8xf32> to vector<8xf32>
    %64 = vector.shape_cast %63 : vector<8xf32> to vector<8x1xf32>
    %65 = vector.broadcast %64 : vector<8x1xf32> to vector<8x8xf32>
    %66 = arith.divf %62, %65 : vector<8x8xf32>
    %67 = arith.truncf %66 : vector<8x8xf32> to vector<8x8xbf16>
    %cst_19 = arith.constant dense<0.000000e+00> : vector<8x32xf32>
    %68 = tpu.matmul %67, %56, %cst_19 {dimension_numbers = #tpu.dot_dimension_numbers<[1], [0], [0], [1], [0, 0, 1, 1], [], []>} : vector<8x8xbf16>, vector<8x32xbf16>, vector<8x32xf32> -> vector<8x32xf32>
    %69 = arith.truncf %68 : vector<8x32xf32> to vector<8x32xbf16>
    %70 = tpu.concatenate %21, %37, %53, %69 in 1 : vector<8x32xbf16>, vector<8x32xbf16>, vector<8x32xbf16>, vector<8x32xbf16> -> vector<8x128xbf16>
    %c0_20 = arith.constant 0 : index
    %c0_21 = arith.constant 0 : index
    %71 = vector.load %arg4[%c0_20, %c0_21] : memref<1x32xf32, #tpu.memory_space<vmem>>, vector<1x32xf32>
    %72 = vector.broadcast %71 : vector<1x32xf32> to vector<8x32xf32>
    %73 = arith.addf %1, %72 : vector<8x32xf32>
    %c0_22 = arith.constant 0 : index
    %c0_23 = arith.constant 0 : index
    %74 = vector.load %arg3[%c0_22, %c0_23] : memref<128x32xbf16, #tpu.memory_space<vmem>>, vector<128x32xbf16>
    %cst_24 = arith.constant dense<0.000000e+00> : vector<8x32xf32>
    %75 = tpu.matmul %70, %74, %cst_24 {dimension_numbers = #tpu.dot_dimension_numbers<[1], [0], [0], [1], [0, 0, 1, 1], [], []>} : vector<8x128xbf16>, vector<128x32xbf16>, vector<8x32xf32> -> vector<8x32xf32>
    %76 = arith.addf %73, %75 : vector<8x32xf32>
    %77 = arith.truncf %76 : vector<8x32xf32> to vector<8x32xbf16>
    %c0_25 = arith.constant 0 : index
    %c0_26 = arith.constant 0 : index
    %c0_27 = arith.constant 0 : index
    %78 = vector.load %arg5[%c0_25, %c0_26, %c0_27] : memref<1x8x32xbf16, #tpu.memory_space<vmem>>, vector<1x8x32xbf16>
    %79 = vector.shape_cast %78 : vector<1x8x32xbf16> to vector<8x32xbf16>
    %80 = vector.shape_cast %77 : vector<8x32xbf16> to vector<1x8x32xbf16>
    tpu.vector_store %arg5[%c0_25, %c0_26, %c0_27], %80 {strides = array<i32>} : memref<1x8x32xbf16, #tpu.memory_space<vmem>>, vector<1x8x32xbf16>,
    %cst_28 = arith.constant dense<0.000000e+00> : vector<32xf32>
    %81 = vector.multi_reduction <add>, %76, %cst_28 [0] : vector<8x32xf32> to vector<32xf32>
    %82 = vector.shape_cast %81 : vector<32xf32> to vector<1x32xf32>
    %c0_29 = arith.constant 0 : index
    %c0_30 = arith.constant 0 : index
    %c0_31 = arith.constant 0 : index
    %83 = vector.load %arg6[%c0_29, %c0_30, %c0_31] : memref<1x1x32xf32, #tpu.memory_space<vmem>>, vector<1x1x32xf32>
    %84 = vector.shape_cast %83 : vector<1x1x32xf32> to vector<1x32xf32>
    %85 = vector.shape_cast %82 : vector<1x32xf32> to vector<1x1x32xf32>
    tpu.vector_store %arg6[%c0_29, %c0_30, %c0_31], %85 {strides = array<i32>} : memref<1x1x32xf32, #tpu.memory_space<vmem>>, vector<1x1x32xf32>,
    %86 = arith.mulf %76, %76 : vector<8x32xf32>
    %cst_32 = arith.constant dense<0.000000e+00> : vector<32xf32>
    %87 = vector.multi_reduction <add>, %86, %cst_32 [0] : vector<8x32xf32> to vector<32xf32>
    %88 = vector.shape_cast %87 : vector<32xf32> to vector<1x32xf32>
    %c0_33 = arith.constant 0 : index
    %c0_34 = arith.constant 0 : index
    %c0_35 = arith.constant 0 : index
    %89 = vector.load %arg7[%c0_33, %c0_34, %c0_35] : memref<1x1x32xf32, #tpu.memory_space<vmem>>, vector<1x1x32xf32>
    %90 = vector.shape_cast %89 : vector<1x1x32xf32> to vector<1x32xf32>
    %91 = vector.shape_cast %88 : vector<1x32xf32> to vector<1x1x32xf32>
    tpu.vector_store %arg7[%c0_33, %c0_34, %c0_35], %91 {strides = array<i32>} : memref<1x1x32xf32, #tpu.memory_space<vmem>>, vector<1x1x32xf32>,
    return
  }
  func.func @transform_0(%arg0: i32) -> (i32, i32, i32) {
    %c0_i32 = arith.constant 0 : i32
    %c0_i32_0 = arith.constant 0 : i32
    %c0_i32_1 = arith.constant 0 : i32
    return %arg0, %c0_i32, %c0_i32_0 : i32, i32, i32
  }
  func.func @transform_1(%arg0: i32) -> (i32, i32) {
    %c0_i32 = arith.constant 0 : i32
    %c0_i32_0 = arith.constant 0 : i32
    %c0_i32_1 = arith.constant 0 : i32
    return %c0_i32, %c0_i32_0 : i32, i32
  }
  func.func @transform_2(%arg0: i32) -> (i32, i32) {
    %c0_i32 = arith.constant 0 : i32
    %c0_i32_0 = arith.constant 0 : i32
    %c0_i32_1 = arith.constant 0 : i32
    return %c0_i32, %c0_i32_0 : i32, i32
  }
  func.func @transform_3(%arg0: i32) -> (i32, i32) {
    %c0_i32 = arith.constant 0 : i32
    %c0_i32_0 = arith.constant 0 : i32
    %c0_i32_1 = arith.constant 0 : i32
    return %c0_i32, %c0_i32_0 : i32, i32
  }
  func.func @transform_4(%arg0: i32) -> (i32, i32, i32) {
    %c0_i32 = arith.constant 0 : i32
    %c0_i32_0 = arith.constant 0 : i32
    %c0_i32_1 = arith.constant 0 : i32
    return %arg0, %c0_i32, %c0_i32_0 : i32, i32, i32
  }
  func.func @transform_5(%arg0: i32) -> (i32, i32, i32) {
    %c0_i32 = arith.constant 0 : i32
    %c0_i32_0 = arith.constant 0 : i32
    %c0_i32_1 = arith.constant 0 : i32
    return %arg0, %c0_i32, %c0_i32_0 : i32, i32, i32
  }
  func.func @transform_6(%arg0: i32) -> (i32, i32, i32) {
    %c0_i32 = arith.constant 0 : i32
    %c0_i32_0 = arith.constant 0 : i32
    %c0_i32_1 = arith.constant 0 : i32
    return %arg0, %c0_i32, %c0_i32_0 : i32, i32, i32
  }
}

module attributes {stable_mosaic.version = 11 : i64} {
  func.func @mlp_block_kernel(%arg0: i32, %arg1: memref<16x32xbf16, #tpu.memory_space<vmem>>, %arg2: memref<1x32xf32, #tpu.memory_space<vmem>>, %arg3: memref<1x32xf32, #tpu.memory_space<vmem>>, %arg4: memref<32x128xbf16, #tpu.memory_space<vmem>>, %arg5: memref<1x128xf32, #tpu.memory_space<vmem>>, %arg6: memref<128x32xbf16, #tpu.memory_space<vmem>>, %arg7: memref<1x32xf32, #tpu.memory_space<vmem>>, %arg8: memref<16x32xbf16, #tpu.memory_space<vmem>>, %arg9: memref<1x1x32xf32, #tpu.memory_space<vmem>>, %arg10: memref<1x1x32xf32, #tpu.memory_space<vmem>>) attributes {dimension_semantics = [#tpu.dimension_semantics<parallel>], iteration_bounds = array<i64: 1>, scalar_prefetch = 0 : i64, scratch_operands = 0 : i64, tpu.core_type = #tpu.core_type<tc>, window_params = [{transform_indices = @transform_0, window_bounds = array<i64: 16, 32>}, {pipeline_mode = #tpu.pipeline_mode<synchronous>, transform_indices = @transform_1, window_bounds = array<i64: 1, 32>}, {pipeline_mode = #tpu.pipeline_mode<synchronous>, transform_indices = @transform_2, window_bounds = array<i64: 1, 32>}, {pipeline_mode = #tpu.pipeline_mode<synchronous>, transform_indices = @transform_3, window_bounds = array<i64: 32, 128>}, {pipeline_mode = #tpu.pipeline_mode<synchronous>, transform_indices = @transform_4, window_bounds = array<i64: 1, 128>}, {pipeline_mode = #tpu.pipeline_mode<synchronous>, transform_indices = @transform_5, window_bounds = array<i64: 128, 32>}, {pipeline_mode = #tpu.pipeline_mode<synchronous>, transform_indices = @transform_6, window_bounds = array<i64: 1, 32>}, {transform_indices = @transform_7, window_bounds = array<i64: 16, 32>}, {transform_indices = @transform_8, window_bounds = array<i64: 1, 1, 32>}, {transform_indices = @transform_9, window_bounds = array<i64: 1, 1, 32>}]} {
    %c0 = arith.constant 0 : index
    %c0_0 = arith.constant 0 : index
    %0 = vector.load %arg1[%c0, %c0_0] : memref<16x32xbf16, #tpu.memory_space<vmem>>, vector<16x32xbf16>
    %1 = arith.extf %0 : vector<16x32xbf16> to vector<16x32xf32>
    %c0_1 = arith.constant 0 : index
    %c0_2 = arith.constant 0 : index
    %2 = vector.load %arg2[%c0_1, %c0_2] : memref<1x32xf32, #tpu.memory_space<vmem>>, vector<1x32xf32>
    %3 = vector.broadcast %2 : vector<1x32xf32> to vector<16x32xf32>
    %4 = arith.mulf %1, %3 : vector<16x32xf32>
    %c0_3 = arith.constant 0 : index
    %c0_4 = arith.constant 0 : index
    %5 = vector.load %arg3[%c0_3, %c0_4] : memref<1x32xf32, #tpu.memory_space<vmem>>, vector<1x32xf32>
    %6 = vector.broadcast %5 : vector<1x32xf32> to vector<16x32xf32>
    %7 = arith.addf %4, %6 : vector<16x32xf32>
    %8 = arith.truncf %7 : vector<16x32xf32> to vector<16x32xbf16>
    %c0_5 = arith.constant 0 : index
    %c0_6 = arith.constant 0 : index
    %9 = vector.load %arg4[%c0_5, %c0_6] : memref<32x128xbf16, #tpu.memory_space<vmem>>, vector<32x128xbf16>
    %cst = arith.constant dense<0.000000e+00> : vector<16x128xf32>
    %10 = tpu.matmul %8, %9, %cst {dimension_numbers = #tpu.dot_dimension_numbers<[1], [0], [0], [1], [0, 0, 1, 1], [], []>} : vector<16x32xbf16>, vector<32x128xbf16>, vector<16x128xf32> -> vector<16x128xf32>
    %c0_7 = arith.constant 0 : index
    %c0_8 = arith.constant 0 : index
    %11 = vector.load %arg5[%c0_7, %c0_8] : memref<1x128xf32, #tpu.memory_space<vmem>>, vector<1x128xf32>
    %12 = vector.broadcast %11 : vector<1x128xf32> to vector<16x128xf32>
    %13 = arith.addf %10, %12 : vector<16x128xf32>
    %cst_9 = arith.constant 0.000000e+00 : f32
    %14 = vector.broadcast %cst_9 : f32 to vector<16x128xf32>
    %15 = arith.maximumf %13, %14 : vector<16x128xf32>
    %16 = arith.truncf %15 : vector<16x128xf32> to vector<16x128xbf16>
    %c0_10 = arith.constant 0 : index
    %c0_11 = arith.constant 0 : index
    %17 = vector.load %arg6[%c0_10, %c0_11] : memref<128x32xbf16, #tpu.memory_space<vmem>>, vector<128x32xbf16>
    %cst_12 = arith.constant dense<0.000000e+00> : vector<16x32xf32>
    %18 = tpu.matmul %16, %17, %cst_12 {dimension_numbers = #tpu.dot_dimension_numbers<[1], [0], [0], [1], [0, 0, 1, 1], [], []>} : vector<16x128xbf16>, vector<128x32xbf16>, vector<16x32xf32> -> vector<16x32xf32>
    %c0_13 = arith.constant 0 : index
    %c0_14 = arith.constant 0 : index
    %19 = vector.load %arg7[%c0_13, %c0_14] : memref<1x32xf32, #tpu.memory_space<vmem>>, vector<1x32xf32>
    %20 = vector.broadcast %19 : vector<1x32xf32> to vector<16x32xf32>
    %21 = arith.addf %18, %20 : vector<16x32xf32>
    %22 = arith.addf %21, %7 : vector<16x32xf32>
    %23 = arith.truncf %22 : vector<16x32xf32> to vector<16x32xbf16>
    %c0_15 = arith.constant 0 : index
    %c0_16 = arith.constant 0 : index
    %24 = vector.load %arg8[%c0_15, %c0_16] : memref<16x32xbf16, #tpu.memory_space<vmem>>, vector<16x32xbf16>
    tpu.vector_store %arg8[%c0_15, %c0_16], %23 {strides = array<i32>} : memref<16x32xbf16, #tpu.memory_space<vmem>>, vector<16x32xbf16>,
    %cst_17 = arith.constant dense<0.000000e+00> : vector<32xf32>
    %25 = vector.multi_reduction <add>, %22, %cst_17 [0] : vector<16x32xf32> to vector<32xf32>
    %26 = vector.shape_cast %25 : vector<32xf32> to vector<1x32xf32>
    %c0_18 = arith.constant 0 : index
    %c0_19 = arith.constant 0 : index
    %c0_20 = arith.constant 0 : index
    %27 = vector.load %arg9[%c0_18, %c0_19, %c0_20] : memref<1x1x32xf32, #tpu.memory_space<vmem>>, vector<1x1x32xf32>
    %28 = vector.shape_cast %27 : vector<1x1x32xf32> to vector<1x32xf32>
    %29 = vector.shape_cast %26 : vector<1x32xf32> to vector<1x1x32xf32>
    tpu.vector_store %arg9[%c0_18, %c0_19, %c0_20], %29 {strides = array<i32>} : memref<1x1x32xf32, #tpu.memory_space<vmem>>, vector<1x1x32xf32>,
    %30 = arith.mulf %22, %22 : vector<16x32xf32>
    %cst_21 = arith.constant dense<0.000000e+00> : vector<32xf32>
    %31 = vector.multi_reduction <add>, %30, %cst_21 [0] : vector<16x32xf32> to vector<32xf32>
    %32 = vector.shape_cast %31 : vector<32xf32> to vector<1x32xf32>
    %c0_22 = arith.constant 0 : index
    %c0_23 = arith.constant 0 : index
    %c0_24 = arith.constant 0 : index
    %33 = vector.load %arg10[%c0_22, %c0_23, %c0_24] : memref<1x1x32xf32, #tpu.memory_space<vmem>>, vector<1x1x32xf32>
    %34 = vector.shape_cast %33 : vector<1x1x32xf32> to vector<1x32xf32>
    %35 = vector.shape_cast %32 : vector<1x32xf32> to vector<1x1x32xf32>
    tpu.vector_store %arg10[%c0_22, %c0_23, %c0_24], %35 {strides = array<i32>} : memref<1x1x32xf32, #tpu.memory_space<vmem>>, vector<1x1x32xf32>,
    return
  }
  func.func @transform_0(%arg0: i32) -> (i32, i32) {
    %c0_i32 = arith.constant 0 : i32
    %c0_i32_0 = arith.constant 0 : i32
    return %arg0, %c0_i32 : i32, i32
  }
  func.func @transform_1(%arg0: i32) -> (i32, i32) {
    %c0_i32 = arith.constant 0 : i32
    %c0_i32_0 = arith.constant 0 : i32
    %c0_i32_1 = arith.constant 0 : i32
    return %c0_i32, %c0_i32_0 : i32, i32
  }
  func.func @transform_2(%arg0: i32) -> (i32, i32) {
    %c0_i32 = arith.constant 0 : i32
    %c0_i32_0 = arith.constant 0 : i32
    %c0_i32_1 = arith.constant 0 : i32
    return %c0_i32, %c0_i32_0 : i32, i32
  }
  func.func @transform_3(%arg0: i32) -> (i32, i32) {
    %c0_i32 = arith.constant 0 : i32
    %c0_i32_0 = arith.constant 0 : i32
    %c0_i32_1 = arith.constant 0 : i32
    return %c0_i32, %c0_i32_0 : i32, i32
  }
  func.func @transform_4(%arg0: i32) -> (i32, i32) {
    %c0_i32 = arith.constant 0 : i32
    %c0_i32_0 = arith.constant 0 : i32
    %c0_i32_1 = arith.constant 0 : i32
    return %c0_i32, %c0_i32_0 : i32, i32
  }
  func.func @transform_5(%arg0: i32) -> (i32, i32) {
    %c0_i32 = arith.constant 0 : i32
    %c0_i32_0 = arith.constant 0 : i32
    %c0_i32_1 = arith.constant 0 : i32
    return %c0_i32, %c0_i32_0 : i32, i32
  }
  func.func @transform_6(%arg0: i32) -> (i32, i32) {
    %c0_i32 = arith.constant 0 : i32
    %c0_i32_0 = arith.constant 0 : i32
    %c0_i32_1 = arith.constant 0 : i32
    return %c0_i32, %c0_i32_0 : i32, i32
  }
  func.func @transform_7(%arg0: i32) -> (i32, i32) {
    %c0_i32 = arith.constant 0 : i32
    %c0_i32_0 = arith.constant 0 : i32
    return %arg0, %c0_i32 : i32, i32
  }
  func.func @transform_8(%arg0: i32) -> (i32, i32, i32) {
    %c0_i32 = arith.constant 0 : i32
    %c0_i32_0 = arith.constant 0 : i32
    %c0_i32_1 = arith.constant 0 : i32
    return %arg0, %c0_i32, %c0_i32_0 : i32, i32, i32
  }
  func.func @transform_9(%arg0: i32) -> (i32, i32, i32) {
    %c0_i32 = arith.constant 0 : i32
    %c0_i32_0 = arith.constant 0 : i32
    %c0_i32_1 = arith.constant 0 : i32
    return %arg0, %c0_i32, %c0_i32_0 : i32, i32, i32
  }
}

</mosaic_0001>

<bundles_post_ra>
// kernel: transformer_block.3
= control target key start
LH: loop header
LB: loop body
LE: loop exit
PB: predicated region body
PF: predicated region fallthrough
CT: control target
= control target key end

     0   :  { %vm67_vm0 = vcmask 261120   ;;  %vm174_vm1 = vcmask 257024   ;;  %vm186_vm2 = vcmask 253952   ;;  %s383_s3 = inlined_call_operand.vmem [shape: bf16[32,128], index: 3, kind: input, shape index: {}]   ;;  %s384_s0 = inlined_call_operand.vmem [shape: bf16[16,32], index: 0, kind: input, shape index: {}]   ;;  %s385_s1 = inlined_call_operand.vmem [shape: f32[1,32], index: 1, kind: input, shape index: {}]   ;;  %s386_s2 = inlined_call_operand.vmem [shape: f32[1,32], index: 2, kind: input, shape index: {}]   ;;  %s387_s5 = inlined_call_operand.vmem [shape: bf16[128,32], index: 5, kind: input, shape index: {}]   ;;  %s388_s4 = inlined_call_operand.vmem [shape: f32[1,128], index: 4, kind: input, shape index: {}]   ;;  %s389_s6 = inlined_call_operand.vmem [shape: f32[1,32], index: 6, kind: input, shape index: {}]   ;;  %s390_s7 = inlined_call_operand.vmem [shape: bf16[16,32], index: 7, kind: output, shape index: {0}]   ;;  %s391_s8 = inlined_call_operand.vmem [shape: f32[1,1,32], index: 8, kind: output, shape index: {1}]   ;;  %s392_s9 = inlined_call_operand.vmem [shape: f32[1,1,32], index: 9, kind: output, shape index: {2}]  }
   0x1   :  { %v254_v0 = vld [vmem:[%s383_s3 + $0x8] sm:$0xff]  ;;  %v264_v1 = vld [vmem:[%s384_s0] sm:$0xff]   ;;  %v262_v7 = vld [vmem:[%s387_s5 + $0x38] sm:$0xff] }
   0x2   :  { %v265_v2 = vunpack.c.l.bf16 %v264_v1  ;;  %v266_v3 = vunpack.c.h.bf16 %v264_v1  ;;  %v267_v4 = vld [vmem:[%s385_s1] ss:$0 sm:$0xff]  ;;  %77 = vmatpush.bf16.msra.mxu0 %v254_v0  ;;  %156 = vmatpush.bf16.msra.mxu1 %v262_v7  ;;  %v261_v10 = vld [vmem:[%s387_s5 + $0x30] sm:$0xff]  ;;  %v260_v14 = vld [vmem:[%s387_s5 + $0x28] sm:$0xff] }
   0x3   :  { %v253_v5 = vld [vmem:[%s383_s3] sm:$0xff]  ;;  %v258_v16 = vld [vmem:[%s387_s5 + $0x18] sm:$0xff]  ;;  %v257_v17 = vld [vmem:[%s387_s5 + $0x10] sm:$0xff] }
   0x4   :  { %v268_v6 = vld [vmem:[%s386_s2] ss:$0 sm:$0xff]  ;;  %v38_v8 = vmul.f32 %v267_v4, %v265_v2  ;;  %v39_v9 = vmul.f32 %v267_v4, %v266_v3  ;;  %v256_v18 = vld [vmem:[%s387_s5 + $0x8] sm:$0xff] }
   0x5   :  { %v259_v15 = vld [vmem:[%s387_s5 + $0x20] sm:$0xff] }
   0x6   :  { %v44_v11 = vadd.f32 %v268_v6, %v38_v8  ;;  %v45_v12 = vadd.f32 %v268_v6, %v39_v9  ;;  %78 = vmatpush.bf16.msra.mxu0 %v253_v5  ;;  %157 = vmatpush.bf16.msra.mxu1 %v261_v10  ;;  %v255_v19 = vld [vmem:[%s387_s5] sm:$0xff] }
   0x7   :  { %v269_v21 = vld [vmem:[%s388_s4] ss:$0 sm:$0xff] }
   0x8   :  { %v46_v13 = vpack.c.bf16 %v45_v12, %v44_v11  ;;  %v270_v28 = vld [vmem:[%s389_s6] ss:$0 sm:$0xff] }
   0xa   :  { %220 = vmatmul.msk.bf16.vlgmr.msra.gmra.mxu0 %vm67_vm0, %v46_v13  ;;  %158 = vmatpush.bf16.msra.mxu1 %v260_v14 }
   0xe   :  { %159 = vmatpush.bf16.msra.mxu1 %v259_v15 }
  0x12   :  { %160 = vmatpush.bf16.msra.mxu1 %v258_v16 }
  0x16   :  { %161 = vmatpush.bf16.msra.mxu1 %v257_v17 }
  0x1a   :  { %162 = vmatpush.bf16.msra.mxu1 %v256_v18 }
  0x1e   :  { %163 = vmatpush.bf16.msra.mxu1 %v255_v19 }
  0x87   :  { %v80_v20 = vpop.f32.mrf.mxu0 }
  0x88   :  { %v81_v22 = vadd.f32 %v269_v21, %v80_v20 }
  0x8a   :  { %v85_v25 = vmax.f32 %v81_v22, 0.0 }
  0x8f   :  { %v82_v23 = vpop.f32.mrf.mxu0 }
  0x90   :  { %v83_v24 = vadd.f32 %v269_v21, %v82_v23 }
  0x92   :  { %v86_v26 = vmax.f32 %v83_v24, 0.0 }
  0x94   :  { %v87_v27 = vpack.c.bf16 %v86_v26, %v85_v25 }
  0x96   :  { %164 = vmatmul.bf16.vlgmr.msra.gmra.mxu1 %v87_v27 }
 0x113   :  { %v165_v29 = vpop.f32.mrf.mxu1 }
 0x114   :  { %v166_v30 = vadd.f32 %v270_v28, %v165_v29 }
 0x116   :  { %v170_v31 = vadd.f32 %v166_v30, %v44_v11 }
 0x118   :  { %v172_v32 = vpack.c.bf16 %v170_v31, %v170_v31  ;;  %v188_v35 = vmul.f32 %v170_v31, %v170_v31  ;;  %v177_v37 = vsel %vm67_vm0, %v170_v31, 0.0 }
 0x11a   :  { %175 = vst.msk [vmem:[%s390_s7] sm:$0xf] %vm174_vm1, %v172_v32  ;;  %v190_v42 = vsel %vm67_vm0, %v188_v35, 0.0 }
 0x11b   :  { %v167_v33 = vpop.f32.mrf.mxu1 }
 0x11c   :  { %v168_v34 = vadd.f32 %v270_v28, %v167_v33 }
 0x11e   :  { %v171_v36 = vadd.f32 %v168_v34, %v45_v12 }
 0x120   :  { %v173_v38 = vpack.c.bf16 %v171_v36, %v171_v36  ;;  %v178_v39 = vsel %vm67_vm0, %v171_v36, 0.0  ;;  %v189_v40 = vmul.f32 %v171_v36, %v171_v36 }
 0x121   :  { %v179_v41 = vadd.f32 %v178_v39, %v177_v37 }
 0x122   :  { %176 = vst.msk [vmem:[%s390_s7 + $0x4] sm:$0xf] %vm174_vm1, %v173_v38  ;;  %v191_v43 = vsel %vm67_vm0, %v189_v40, 0.0 }
 0x123   :  { %v180_v44 = vrot.slane %v179_v41, 4  ;;  %v192_v45 = vadd.f32 %v191_v43, %v190_v42 }
 0x125   :  { %v181_v46 = vadd.f32 %v180_v44, %v179_v41  ;;  %v193_v47 = vrot.slane %v192_v45, 4 }
 0x127   :  { %v182_v48 = vrot.slane %v181_v46, 2  ;;  %v194_v49 = vadd.f32 %v193_v47, %v192_v45 }
 0x129   :  { %v183_v50 = vadd.f32 %v182_v48, %v181_v46  ;;  %v195_v51 = vrot.slane %v194_v49, 2 }
 0x12b   :  { %v184_v52 = vrot.slane %v183_v50, 1  ;;  %v196_v53 = vadd.f32 %v195_v51, %v194_v49 }
 0x12d   :  { %v185_v54 = vadd.f32 %v184_v52, %v183_v50  ;;  %v197_v55 = vrot.slane %v196_v53, 1 }
 0x12f   :  { %187 = vst.msk [vmem:[%s391_s8] sm:$0x1] %vm186_vm2, %v185_v54  ;;  %v198_v56 = vadd.f32 %v197_v55, %v196_v53 }
 0x131   :  { %199 = vst.msk [vmem:[%s392_s9] sm:$0x1] %vm186_vm2, %v198_v56 }

// kernel: transformer_block.2
= control target key start
LH: loop header
LB: loop body
LE: loop exit
PB: predicated region body
PF: predicated region fallthrough
CT: control target
= control target key end

     0   :  { %s1032_s21 = smov 0   ;;  %s1179_s0 = inlined_call_operand.vmem [shape: f32[2,8,32], index: 0, kind: input, shape index: {}]   ;;  %s1180_s1 = inlined_call_operand.vmem [shape: bf16[32,384], index: 1, kind: input, shape index: {}]   ;;  %s1181_s2 = inlined_call_operand.vmem [shape: bf16[128,32], index: 2, kind: input, shape index: {}]   ;;  %s1182_s3 = inlined_call_operand.vmem [shape: f32[1,32], index: 3, kind: input, shape index: {}]   ;;  %s1183_s4 = inlined_call_operand.vmem [shape: bf16[2,8,32], index: 4, kind: output, shape index: {0}]   ;;  %s1184_s5 = inlined_call_operand.vmem [shape: f32[2,1,32], index: 5, kind: output, shape index: {1}]   ;;  %s1185_s6 = inlined_call_operand.vmem [shape: f32[2,1,32], index: 6, kind: output, shape index: {2}]  }
   0x1 LB: > { %s868_s22 = sadd.s32 4294967295, %s992_s21   ;;  %p872_p0 = scmp.ge.s32.totalorder %s992_s21, 1  ;;  %s992_s21 = sphi %s1032_s21, %s17_s21  }
   0x2   : > { %p216_p1 = scmp.lt.s32.totalorder %s992_s21, 3 }
   0x4   : > { %p217_p2 = pnand %p872_p0, %p216_p1 }
   0x5   : > { %p250_p3 = scmp.lt.s32.totalorder (!%p217_p2), %s868_s22, 1  ;;  %s994_s19 = smov (!%p217_p2), 64  }
   0x6   : > { %220 = sbr.rel (%p217_p2) target bundleno = 1100 (0x44c), region = 36  ;;  %s995_s20 = smov (!%p217_p2), 96  }
   0x7   : > { %s996_s23 = smov (!%p217_p2), 32  }
   0xb   : > { %v889_v0 = vld [vmem:[%s1180_s1 + $0x18] sm:$0xf]  ;;  %v948_v1 = vld [vmem:[%s1180_s1 + $0x20] sm:$0xf0]  ;;  %v947_v2 = vld [vmem:[%s1180_s1 + $0x1c] sm:$0xf] }
   0xc   : > { %v890_v3 = vor.u32 %v948_v1, %v889_v0  ;;  %v891_v4 = vld [vmem:[%s1180_s1 + $0x24] sm:$0xf0]  ;;  %v877_v5 = vld [vmem:[%s1180_s1] sm:$0xf]  ;;  %v945_v6 = vld [vmem:[%s1180_s1 + $0x8] sm:$0xf0] }
   0xd   : > { %v894_v7 = vor.u32 %v947_v2, %v891_v4  ;;  %v944_v8 = vld [vmem:[%s1180_s1 + $0x4] sm:$0xf]  ;;  %v879_v9 = vld [vmem:[%s1180_s1 + $0xc] sm:$0xf0]  ;;  %v878_v10 = vor.u32 %v945_v6, %v877_v5  ;;  %s1187_s22 = smov (!%p250_p3, %s868_s22), 1  ;;  %vm307_vm0 = vcmask 261120  }
   0xe   : > { %317 = vmatpush.bf16.msra.mxu0 %v890_v3  ;;  %v882_v11 = vor.u32 %v944_v8, %v879_v9  ;;  %s873_s15 = sshll.u32 %s1187_s22, 3  ;;  %vm374_vm1 = vcmask 64512   ;;  %v897_v36 = vld [vmem:[%s1180_s1 + $0x20] sm:$0xf]  ;;  %v949_v37 = vld [vmem:[%s1180_s1 + $0x28] sm:$0xf0]  ;;  %s260_s10 = scalar_lea.vmem %s1184_s5, %s1187_s22 }
   0xf   : > { %330 = vmatpush.bf16.msra.mxu1 %v894_v7  ;;  %s253_s18 = scalar_lea.vmem %s1179_s0, %s873_s15  ;;  %v898_v38 = vor.u32 %v949_v37, %v897_v36  ;;  %v885_v39 = vld [vmem:[%s1180_s1 + $0x8] sm:$0xf]  ;;  %v946_v40 = vld [vmem:[%s1180_s1 + $0x10] sm:$0xf0]  ;;  %vm403_vm2 = vcmask 1043456   ;;  %s874_s28 = sshll.u32 %s1187_s22, 2 }
  0x10   : > { %v1070_v12 = vld [vmem:[%s253_s18] sm:$0xff]  ;;  %v886_v41 = vor.u32 %v946_v40, %v885_v39  ;;  %s257_s7 = scalar_lea.vmem %s1183_s4, %s874_s28  ;;  %s263_s13 = scalar_lea.vmem %s1185_s6, %s1187_s22 }
  0x11   : > { %v266_v13 = vpack.c.bf16 %v1070_v12, %v1070_v12  ;;  %343 = vmatpush.bf16.msra.mxu2 %v898_v38 }
  0x12   : > { %318 = vmatpush.bf16.msra.mxu0 %v878_v10 }
  0x13   : > { %331 = vmatpush.bf16.msra.mxu1 %v882_v11 }
  0x15   : > { %899 = vmatmul.msk.bf16.vlgmr.msra.gmra.mxu0 %vm307_vm0, %v266_v13  ;;  %344 = vmatpush.bf16.msra.mxu2 %v886_v41 }
  0x16   : > { %900 = vmatmul.msk.bf16.vlgmr.msra.gmra.mxu1 %vm307_vm0, %v266_v13 }
  0x18   : > { %901 = vmatmul.msk.bf16.vlgmr.msra.gmra.mxu2 %vm307_vm0, %v266_v13 }
  0x92   : > { %v320_v14 = vpop.f32.mrf.mxu0 }
  0x93   : > { %v333_v15 = vpop.f32.mrf.mxu1 }
  0x94   : > { %v350_v16 = vpack.c.bf16 %v333_v15, %v320_v14 }
  0x96   : > { %v353_v17 = vunpack.c.h.b16 %v350_v16  ;;  %v421_v18 = vunpack.c.l.b16 %v350_v16 }
  0x98   : > { %v354_v19 = vpack.c.b16 %v353_v17, %v353_v17  ;;  %v422_v20 = vpack.c.b16 %v421_v18, %v421_v18 }
  0x9a   : > { %496 = vrot.lane.b32.xlu2 %v422_v20, %s994_s19  ;;  %498 = vrot.lane.b32.xlu1 %v354_v19, %s994_s19  ;;  %v359_v21 = vsel %vm307_vm0, %v354_v19, 0  ;;  %v322_v22 = vpop.f32.mrf.mxu0 }
  0x9b   : > { %425 = vrot.lane.b32.xlu0 %v354_v19, %s995_s20  ;;  %v335_v23 = vpop.f32.mrf.mxu1  ;;  %368 = vmatpush.bf16.xpose.msra.mxu3 %v359_v21  ;;  %v346_v56 = vpop.f32.mrf.mxu2 }
  0x9c   : > { %v351_v61 = vpack.c.bf16 %v346_v56, %v346_v56 }
  0x9e   : > { %v405_v62 = vsel %vm403_vm2, %v351_v61, 0  ;;  %v472_v7 = vunpack.c.l.b16 %v351_v61 }
  0x9f   : > { %414 = vmatpush.bf16.msrb.mxu0 %v405_v62 }
  0xa0   : > { %v473_v15 = vpack.c.b16 %v472_v7, %v472_v7 }
  0xa2   : > { %566 = vrot.lane.b32.xlu2 %v422_v20, %s996_s23  ;;  %568 = vrot.lane.b32.xlu1 %v354_v19, %s996_s23 }
  0xa3   : > { %423 = vrot.lane.b32.xlu0 %v422_v20, %s995_s20  ;;  %902 = vmatmul.msk.bf16.vlgmr.msra.gmra.mxu3 %vm307_vm0, %v350_v16  ;;  %v348_v59 = vpop.f32.mrf.mxu2 }
  0xf4   : > { %v497_v28 = vpop.permute.xlu2 %496 }
  0xfc   : > { %v567_v32 = vpop.permute.xlu2 %566 }
 0x10c   : > { %v499_v24 = vpop.permute.xlu1 %498 }
 0x10d   : > { %v426_v25 = vpop.permute.xlu0 %425  ;;  %v504_v26 = vsel %vm307_vm0, %v499_v24, 0 }
 0x10e   : > { %v431_v27 = vsel %vm307_vm0, %v426_v25, 0  ;;  %513 = vmatpush.bf16.xpose.msrb.mxu3 %v504_v26 }
 0x10f   : > { %440 = vmatpush.bf16.xpose.msrb.mxu1 %v431_v27 }
 0x114   : > { %v569_v29 = vpop.permute.xlu1 %568 }
 0x115   : > { %v574_v30 = vsel %vm307_vm0, %v569_v29, 0  ;;  %v424_v31 = vpop.permute.xlu0 %423  ;;  %906 = vmatmul.msk.bf16.vlgmr.msrb.gmra.mxu3 %vm307_vm0, %v497_v28 }
 0x116   : > { %904 = vmatmul.msk.bf16.vlgmr.msrb.gmra.mxu1 %vm307_vm0, %v424_v31 }
 0x117   : > { %583 = vmatpush.bf16.xpose.msra.mxu1 %v574_v30 }
 0x126   : > { %v370_v33 = vpop.f32.mrf.mxu3  ;;  %908 = vmatmul.msk.bf16.vlgmr.msra.gmra.mxu1 %vm307_vm0, %v567_v32 }
 0x127   : > { %v375_v34 = vsel %vm374_vm1, %v370_v33, -inf }
 0x128   : > { %376 = vmax.xlane.f32.xlu1 %v375_v34 }
 0x12e   : > { %v372_v35 = vpop.f32.mrf.mxu3 }
 0x193   : > { %v442_v42 = vpop.f32.mrf.mxu1 }
 0x194   : > { %v446_v43 = vsel %vm374_vm1, %v442_v42, -inf }
 0x195   : > { %447 = vmax.xlane.f32.xlu0 %v446_v43 }
 0x198   : > { %v515_v44 = vpop.f32.mrf.mxu3 }
 0x199   : > { %v519_v55 = vsel %vm374_vm1, %v515_v44, -inf }
 0x19b   : > { %v444_v45 = vpop.f32.mrf.mxu1  ;;  %v377_v46 = vpop.xlane.xlu1 %376 }
 0x19c   : > { %v378_v47 = vsub.f32 %v370_v33, %v377_v46 }
 0x19e   : > { %v379_v48 = vmul.f32 1.442695, %v378_v47 }
 0x1a0   : > { %970 = vpow2.f32 %v379_v48  ;;  %v517_v49 = vpop.f32.mrf.mxu3 }
 0x1a3   : > { %v585_v50 = vpop.f32.mrf.mxu1 }
 0x1a4   : > { %v589_v51 = vsel %vm374_vm1, %v585_v50, -inf }
 0x1a5   : > { %590 = vmax.xlane.f32.xlu2 %v589_v51 }
 0x1a6   : > { %v971_v52 = vpop.eup %970 }
 0x1a7   : > { %v381_v53 = vsel %vm374_vm1, %v971_v52, 0.0 }
 0x1a8   : > { %382 = vadd.xlane.f32.xlu1 %v381_v53 }
 0x1ab   : > { %v587_v54 = vpop.f32.mrf.mxu1 }
 0x1ad   : > { %520 = vmax.xlane.f32.xlu2 %v519_v55 }
 0x208   : > { %v448_v57 = vpop.xlane.xlu0 %447 }
 0x209   : > { %v449_v58 = vsub.f32 %v442_v42, %v448_v57 }
 0x20b   : > { %v450_v60 = vmul.f32 1.442695, %v449_v58 }
 0x20d   : > { %972 = vpow2.f32 %v450_v60 }
 0x213   : > { %v973_v63 = vpop.eup %972 }
 0x214   : > { %v452_v0 = vsel %vm374_vm1, %v973_v63, 0.0 }
 0x215   : > { %453 = vadd.xlane.f32.xlu0 %v452_v0 }
 0x218   : > { %v591_v1 = vpop.xlane.xlu2 %590 }
 0x219   : > { %v592_v2 = vsub.f32 %v585_v50, %v591_v1 }
 0x21b   : > { %v593_v3 = vmul.f32 1.442695, %v592_v2  ;;  %v383_v4 = vpop.xlane.xlu1 %382 }
 0x21c   : > { %974 = vrcp.f32 %v383_v4  ;;  %v395_v16 = vand.u32 2147483648, %v383_v4  ;;  %v393_v18 = vand.u32 2147483647, %v383_v4  ;;  %vm389_vm4 = vweird.f32 %v383_v4 }
 0x21d   : > { %976 = vpow2.f32 %v593_v3 }
 0x21e   : > { %v396_v20 = vor.u32 1.1754944e-38, %v395_v16  ;;  %vm394_vm6 = vcmp.eq.f32.partialorder %v393_v18, 8.507059e+37 }
 0x220   : > { %v521_v5 = vpop.xlane.xlu2 %520 }
 0x221   : > { %v522_v6 = vsub.f32 %v515_v44, %v521_v5 }
 0x222   : > { %v975_v8 = vpop.eup %974 }
 0x223   : > { %v1110_v9 = vpop.eup %976  ;;  %v385_v10 = vmul.f32 %v975_v8, %v383_v4  ;;  %v523_v11 = vmul.f32 1.442695, %v522_v6  ;;  %vm390_vm3 = vweird.f32 %v975_v8 }
 0x224   : > { %v595_v13 = vsel %vm374_vm1, %v1110_v9, 0.0  ;;  %vm391_vm5 = vmor %vm389_vm4, %vm390_vm3 }
 0x225   : > { %v386_v14 = vsub.f32 1.0, %v385_v10  ;;  %978 = vpow2.f32 %v523_v11  ;;  %596 = vadd.xlane.f32.xlu2 %v595_v13 }
 0x227   : > { %v387_v17 = vmul.f32 %v975_v8, %v386_v14 }
 0x229   : > { %v388_v19 = vadd.f32 %v975_v8, %v387_v17  ;;  %474 = vrot.lane.b32.xlu0 %v473_v15, %s995_s20 }
 0x22b   : > { %v1115_v21 = vpop.eup %978  ;;  %v392_v22 = vsel %vm391_vm5, %v975_v8, %v388_v19 }
 0x22c   : > { %v525_v23 = vsel %vm374_vm1, %v1115_v21, 0.0  ;;  %v397_v24 = vsel %vm394_vm6, %v396_v20, %v392_v22  ;;  %vm745_vm6 = vcmask 257024  }
 0x22d   : > { %526 = vadd.xlane.f32.xlu1 %v525_v23  ;;  %v398_v25 = vmul.f32 %v971_v52, %v397_v24 }
 0x22f   : > { %v399_v26 = vpack.c.bf16 %v398_v25, %v398_v25 }
 0x231   : > { %903 = vmatmul.msk.bf16.vlgmr.msrb.gmra.mxu0 %vm374_vm1, %v399_v26  ;;  %v957_v26 = vld [vmem:[%s1181_s2 + $0x38] sm:$0xff] }
 0x232   : > { %730 = vmatpush.bf16.msra.mxu3 %v957_v26 }
 0x23d   : > { %614 = vrot.lane.b32.xlu2 %v473_v15, %s996_s23 }
 0x246   : > { %544 = vrot.lane.b32.xlu1 %v473_v15, %s994_s19 }
 0x288   : > { %v454_v27 = vpop.xlane.xlu0 %453 }
 0x289   : > { %980 = vrcp.f32 %v454_v27  ;;  %v466_v32 = vand.u32 2147483648, %v454_v27  ;;  %v464_v33 = vand.u32 2147483647, %v454_v27  ;;  %vm460_vm8 = vweird.f32 %v454_v27 }
 0x28b   : > { %v467_v35 = vor.u32 1.1754944e-38, %v466_v32  ;;  %vm465_vm10 = vcmp.eq.f32.partialorder %v464_v33, 8.507059e+37  ;;  %v951_v32 = vld [vmem:[%s1181_s2 + $0x8] sm:$0xff]  ;;  %v950_v33 = vld [vmem:[%s1181_s2] sm:$0xff] }
 0x28f   : > { %v981_v28 = vpop.eup %980 }
 0x290   : > { %v456_v29 = vmul.f32 %v981_v28, %v454_v27  ;;  %vm461_vm7 = vweird.f32 %v981_v28  ;;  %v956_v27 = vld [vmem:[%s1181_s2 + $0x30] sm:$0xff] }
 0x291   : > { %vm462_vm9 = vmor %vm460_vm8, %vm461_vm7  ;;  %731 = vmatpush.bf16.msra.mxu3 %v956_v27  ;;  %vm754_vm7 = vcmask 253952  }
 0x292   : > { %v457_v30 = vsub.f32 1.0, %v456_v29  ;;  %v954_v29 = vld [vmem:[%s1181_s2 + $0x20] sm:$0xff] }
 0x294   : > { %v458_v31 = vmul.f32 %v981_v28, %v457_v30  ;;  %v953_v30 = vld [vmem:[%s1181_s2 + $0x18] sm:$0xff] }
 0x296   : > { %v459_v34 = vadd.f32 %v981_v28, %v458_v31  ;;  %v952_v31 = vld [vmem:[%s1181_s2 + $0x10] sm:$0xff] }
 0x298   : > { %v597_v36 = vpop.xlane.xlu2 %596  ;;  %v463_v37 = vsel %vm462_vm9, %v981_v28, %v459_v34  ;;  %v955_v28 = vld [vmem:[%s1181_s2 + $0x28] sm:$0xff] }
 0x299   : > { %982 = vrcp.f32 %v597_v36  ;;  %v468_v38 = vsel %vm465_vm10, %v467_v35, %v463_v37  ;;  %v609_v49 = vand.u32 2147483648, %v597_v36  ;;  %v607_v51 = vand.u32 2147483647, %v597_v36  ;;  %732 = vmatpush.bf16.msra.mxu3 %v955_v28 }
 0x29a   : > { %v469_v40 = vmul.f32 %v973_v63, %v468_v38  ;;  %vm603_vm12 = vweird.f32 %v597_v36 }
 0x29b   : > { %v475_v39 = vpop.permute.xlu0 %474  ;;  %v610_v54 = vor.u32 1.1754944e-38, %v609_v49  ;;  %vm608_vm14 = vcmp.eq.f32.partialorder %v607_v51, 8.507059e+37 }
 0x29c   : > { %v480_v41 = vsel %vm403_vm2, %v475_v39, 0  ;;  %v470_v42 = vpack.c.bf16 %v469_v40, %v469_v40 }
 0x29d   : > { %489 = vmatpush.bf16.msrb.mxu2 %v480_v41  ;;  %733 = vmatpush.bf16.msra.mxu3 %v954_v29  ;;  %v969_v41 = vld [vmem:[%s1182_s3] ss:$0 sm:$0xff] }
 0x29f   : > { %v983_v43 = vpop.eup %982 }
 0x2a0   : > { %v599_v44 = vmul.f32 %v983_v43, %v597_v36  ;;  %905 = vmatmul.msk.bf16.vlgmr.msrb.gmra.mxu2 %vm374_vm1, %v470_v42  ;;  %v527_v45 = vpop.xlane.xlu1 %526  ;;  %v615_v46 = vpop.permute.xlu2 %614  ;;  %vm604_vm11 = vweird.f32 %v983_v43  ;;  %v665_v42 = vadd.f32 %v969_v41, %v1070_v12 }
 0x2a1   : > { %984 = vrcp.f32 %v527_v45  ;;  %v620_v48 = vsel %vm403_vm2, %v615_v46, 0  ;;  %vm605_vm13 = vmor %vm603_vm12, %vm604_vm11  ;;  %v539_v62 = vand.u32 2147483648, %v527_v45  ;;  %vm533_vm3 = vweird.f32 %v527_v45  ;;  %734 = vmatpush.bf16.msra.mxu3 %v953_v30 }
 0x2a2   : > { %v600_v47 = vsub.f32 1.0, %v599_v44  ;;  %629 = vmatpush.bf16.msra.mxu2 %v620_v48  ;;  %v537_v1 = vand.u32 2147483647, %v527_v45 }
 0x2a3   : > { %v540_v3 = vor.u32 1.1754944e-38, %v539_v62 }
 0x2a4   : > { %v601_v50 = vmul.f32 %v983_v43, %v600_v47  ;;  %vm538_vm5 = vcmp.eq.f32.partialorder %v537_v1, 8.507059e+37 }
 0x2a5   : > { %735 = vmatpush.bf16.msra.mxu3 %v952_v31 }
 0x2a6   : > { %v602_v52 = vadd.f32 %v983_v43, %v601_v50 }
 0x2a7   : > { %v985_v53 = vpop.eup %984 }
 0x2a8   : > { %v606_v55 = vsel %vm605_vm13, %v983_v43, %v602_v52  ;;  %v529_v56 = vmul.f32 %v985_v53, %v527_v45  ;;  %vm534_vm15 = vweird.f32 %v985_v53 }
 0x2a9   : > { %v611_v57 = vsel %vm608_vm14, %v610_v54, %v606_v55  ;;  %vm535_vm4 = vmor %vm533_vm3, %vm534_vm15  ;;  %736 = vmatpush.bf16.msra.mxu3 %v951_v32 }
 0x2aa   : > { %v612_v58 = vmul.f32 %v1110_v9, %v611_v57  ;;  %v530_v59 = vsub.f32 1.0, %v529_v56 }
 0x2ac   : > { %v531_v60 = vmul.f32 %v985_v53, %v530_v59  ;;  %v613_v0 = vpack.c.bf16 %v612_v58, %v612_v58 }
 0x2ad   : > { %737 = vmatpush.bf16.msra.mxu3 %v950_v33 }
 0x2ae   : > { %v532_v61 = vadd.f32 %v985_v53, %v531_v60  ;;  %v416_v63 = vpop.f32.mrf.mxu0 }
 0x2af   : > { %v420_v35 = vpack.c.bf16 %v416_v63, %v416_v63 }
 0x2b0   : > { %909 = vmatmul.msk.bf16.vlgmr.msra.gmra.mxu2 %vm374_vm1, %v613_v0  ;;  %v536_v2 = vsel %vm535_vm4, %v985_v53, %v532_v61 }
 0x2b1   : > { %v541_v4 = vsel %vm538_vm5, %v540_v3, %v536_v2 }
 0x2b2   : > { %v542_v6 = vmul.f32 %v1115_v21, %v541_v4 }
 0x2b4   : > { %v543_v9 = vpack.c.bf16 %v542_v6, %v542_v6 }
 0x2b6   : > { %v418_v5 = vpop.f32.mrf.mxu0 }
 0x2b8   : > { %v545_v7 = vpop.permute.xlu1 %544 }
 0x2b9   : > { %v550_v8 = vsel %vm403_vm2, %v545_v7, 0  ;;  %vm657_vm2 = vcmask 785408  }
 0x2ba   : > { %559 = vmatpush.bf16.msra.mxu0 %v550_v8 }
 0x2bd   : > { %907 = vmatmul.msk.bf16.vlgmr.msra.gmra.mxu0 %vm374_vm1, %v543_v9  ;;  %vm654_vm1 = vcmask 523264  }
 0x323   : > { %v491_v10 = vpop.f32.mrf.mxu2 }
 0x324   : > { %v495_v11 = vpack.c.bf16 %v491_v10, %v491_v10 }
 0x326   : > { %v637_v13 = vunpack.c.l.b16 %v495_v11 }
 0x328   : > { %v638_v14 = vpack.c.b16 %v637_v13, %v637_v13 }
 0x32a   : > { %639 = vrot.lane.b32.xlu0 %v638_v14, %s996_s23 }
 0x32b   : > { %v493_v15 = vpop.f32.mrf.mxu2 }
 0x333   : > { %v631_v16 = vpop.f32.mrf.mxu2 }
 0x334   : > { %v635_v17 = vpack.c.bf16 %v631_v16, %v631_v16 }
 0x336   : > { %v647_v18 = vunpack.c.l.b16 %v635_v17 }
 0x338   : > { %v648_v19 = vpack.c.b16 %v647_v18, %v647_v18 }
 0x33a   : > { %649 = vrot.lane.b32.xlu2 %v648_v19, %s995_s20  ;;  %v561_v20 = vpop.f32.mrf.mxu0 }
 0x33b   : > { %v565_v21 = vpack.c.bf16 %v561_v20, %v561_v20  ;;  %v633_v22 = vpop.f32.mrf.mxu2 }
 0x33d   : > { %v642_v23 = vunpack.c.l.b16 %v565_v21 }
 0x33f   : > { %v643_v24 = vpack.c.b16 %v642_v23, %v642_v23 }
 0x341   : > { %644 = vrot.lane.b32.xlu0 %v643_v24, %s994_s19 }
 0x342   : > { %v563_v25 = vpop.f32.mrf.mxu0 }
 0x394   : > { %v650_v38 = vpop.permute.xlu2 %649 }
 0x39c   : > { %v640_v34 = vpop.permute.xlu0 %639 }
 0x39d   : > { %v653_v36 = vsel %vm307_vm0, %v420_v35, %v640_v34 }
 0x3b3   : > { %v645_v37 = vpop.permute.xlu0 %644 }
 0x3b4   : > { %v656_v39 = vsel %vm654_vm1, %v653_v36, %v645_v37 }
 0x3b5   : > { %v659_v40 = vsel %vm657_vm2, %v656_v39, %v650_v38 }
 0x3b6   : > { %738 = vmatmul.bf16.vlgmr.msra.gmra.mxu3 %v659_v40 }
 0x439   : > { %v739_v43 = vpop.f32.mrf.mxu3 }
 0x43a   : > { %v743_v44 = vadd.f32 %v739_v43, %v665_v42 }
 0x43c   : > { %v744_v45 = vpack.c.bf16 %v743_v44, %v743_v44  ;;  %v747_v46 = vsel %vm307_vm0, %v743_v44, 0.0  ;;  %v756_v47 = vmul.f32 %v743_v44, %v743_v44 }
 0x43d   : > { %v748_v48 = vrot.slane %v747_v46, 4 }
 0x43e   : > { %746 = vst.msk [vmem:[%s257_s7] sm:$0xf] %vm745_vm6, %v744_v45  ;;  %v757_v49 = vsel %vm307_vm0, %v756_v47, 0.0 }
 0x43f   : > { %v749_v50 = vadd.f32 %v748_v48, %v747_v46  ;;  %v758_v12 = vrot.slane %v757_v49, 4 }
 0x441   : > { %v750_v51 = vrot.slane %v749_v50, 2  ;;  %v759_v52 = vadd.f32 %v758_v12, %v757_v49  ;;  %v741_v53 = vpop.f32.mrf.mxu3 }
 0x443   : > { %v751_v54 = vadd.f32 %v750_v51, %v749_v50  ;;  %v760_v55 = vrot.slane %v759_v52, 2 }
 0x445   : > { %v752_v56 = vrot.slane %v751_v54, 1  ;;  %v761_v57 = vadd.f32 %v760_v55, %v759_v52 }
 0x447   : > { %v753_v58 = vadd.f32 %v752_v56, %v751_v54  ;;  %v762_v59 = vrot.slane %v761_v57, 1 }
 0x449   : > { %755 = vst.msk [vmem:[%s260_s10] sm:$0x1] %vm754_vm7, %v753_v58  ;;  %v763_v60 = vadd.f32 %v762_v59, %v761_v57 }
 0x44b   : > { %764 = vst.msk [vmem:[%s263_s13] sm:$0x1] %vm754_vm7, %v763_v60 }
 0x44c PF: > { %s17_s21 = sadd.s32 1, %s992_s21  }
 0x44d   : > { %p14_p4 = scmp.ge.s32.totalorder %s17_s21, 4  }
 0x44f   :  { %16 = sbr.rel (!%p14_p4) target bundleno = 1 (0x1), region = 90 }

</bundles_post_ra>
